<compile_context>
chip_gen: v7x
topology: tpu7x:2x2x1
jax: 0.10.0
libtpu: 0.0.40
codegen_flags: <defaults>
</compile_context>

<pallas_src>
import functools

import jax
import jax.numpy as jnp
from jax import lax
from jax.experimental import pallas as pl
from jax.experimental.pallas import tpu as pltpu

MAX_PREV_TARGETS = 10000
MAX_PREV_DECOYS = 10000

_LANES = 128
_SUB = 8                      # sublane sub-chunk rows processed per inner step
_MAX_BLOCK_ROWS = 256         # history rows (of 128 lanes) per grid tile
_NEG = -3.0e38                # finite "minus infinity" for the masked max


def _round_up(x, m):
    return (x + m - 1) // m * m


def _adaptive_rank_loss_kernel(cur_ref, curt_ref, scal_ref,
                               prev_ref, dw_ref, w2_ref,
                               out_ref, acc1_ref, acc2_ref, dmax_ref,
                               *, inv_max_prev_targets, inv_max_prev_decoys):
    nb = cur_ref.shape[0]                  # current batch size
    n_sub = prev_ref.shape[0] // _SUB      # sub-chunks per history tile
    neg = jnp.float32(_NEG)

    # ---- init accumulators on the first history tile -------------------------
    @pl.when(pl.program_id(0) == 0)
    def _init():
        acc1_ref[...] = jnp.zeros_like(acc1_ref)
        acc2_ref[...] = jnp.zeros_like(acc2_ref)
        dmax_ref[...] = jnp.full(dmax_ref.shape, neg, dmax_ref.dtype)

    cur = cur_ref[...]                     # (N, 1) current scores (resident)
    margin = scal_ref[0, 0]
    c1 = (cur - margin).reshape(nb, 1, 1)  # hinge1 = max(prev - c1, 0)
    c2 = (cur + margin).reshape(nb, 1, 1)  # hinge2 = max(c2 - prev, 0)

    # ---- accumulate this history tile (pure VPU work, 8x128 sub-chunks) ------
    def sub_body(s, carry):
        r0 = pl.multiple_of(s * _SUB, _SUB)
        p = prev_ref[pl.ds(r0, _SUB), :]               # (8, 128) prev scores
        dw = dw_ref[pl.ds(r0, _SUB), :]                # packed: 0 / 1 / 2
        w2 = w2_ref[pl.ds(r0, _SUB), :]                # prev target * sampled

        is_decoy = dw > 0.5                            # any prev decoy
        w1 = (dw > 1.5).astype(jnp.float32)            # prev decoy & sampled

        # running max of ALL previous decoy scores (adaptive scale uses it)
        dmax_ref[...] = jnp.maximum(dmax_ref[...], jnp.where(is_decoy, p, neg))

        pb = p[None, :, :]                             # (1, 8, 128)
        h1 = jnp.maximum(pb - c1, 0.0)                 # (N, 8, 128)
        acc1_ref[...] = acc1_ref[...] + h1 * h1 * w1[None, :, :]
        h2 = jnp.maximum(c2 - pb, 0.0)
        acc2_ref[...] = acc2_ref[...] + h2 * h2 * w2[None, :, :]
        return carry

    lax.fori_loop(0, n_sub, sub_body, 0)

    # ---- finalize on the last history tile -----------------------------------
    @pl.when(pl.program_id(0) == pl.num_programs(0) - 1)
    def _finalize():
        cur_t = curt_ref[...]                          # (N, 1) target mask
        cur_d = 1.0 - cur_t
        has_decoys = scal_ref[0, 1] > 0.5

        # adaptive scale: exp(-clamp(cur - max(prev_decoys), 0))
        max_pd = jnp.max(dmax_ref[...])
        gap = jnp.maximum(cur - max_pd, 0.0)
        scale = jnp.where(has_decoys, jnp.exp(-gap), jnp.ones_like(gap))

        # single cross-lane / cross-sublane reduction of the accumulators
        r1 = jnp.sum(jnp.sum(acc1_ref[...], axis=2), axis=1, keepdims=True)
        r2 = jnp.sum(jnp.sum(acc2_ref[...], axis=2), axis=1, keepdims=True)

        loss1 = jnp.sum(r1 * cur_t * scale) * jnp.float32(inv_max_prev_targets)
        loss2 = jnp.sum(r2 * cur_d) * jnp.float32(inv_max_prev_decoys)
        total = loss1 + loss2
        total = jnp.where(jnp.isnan(total), jnp.float32(0.0), total)

        # degenerate batch (all targets or all decoys) -> trivial loss
        n_t = jnp.sum(cur_t)
        degenerate = jnp.logical_or(n_t < 0.5, n_t > jnp.float32(nb) - 0.5)
        trivial = jnp.sum(cur) * jnp.float32(1e-9)
        out_ref[0, 0] = jnp.where(degenerate, trivial, total)


def adaptive_rank_loss(current_scores, current_labels, margin,
                       prev_scores, prev_labels, subsample_key,
                       max_prev_targets=MAX_PREV_TARGETS,
                       max_prev_decoys=MAX_PREV_DECOYS):
    """Forward pass of AdaptiveRankLoss (Pallas TPU kernel for the hot path)."""
    n = current_scores.shape[0]
    m = prev_scores.shape[0]

    # ---- current-batch tensors -----------------------------------------------
    cur = current_scores.astype(jnp.float32).reshape(n, 1)
    cur_t = (current_labels.astype(jnp.float32) >= 0.5).astype(jnp.float32).reshape(n, 1)

    # ---- history masks (subsampling as Bernoulli 0/1 masks) ------------------
    prev = prev_scores.astype(jnp.float32)
    prev_t = (prev_labels.astype(jnp.float32) >= 0.5).astype(jnp.float32)
    prev_d = 1.0 - prev_t
    n_pt = jnp.sum(prev_t)
    n_pd = jnp.sum(prev_d)
    target_prob = jnp.minimum(1.0, max_prev_targets / jnp.maximum(n_pt, 1.0))
    decoy_prob = jnp.minimum(1.0, max_prev_decoys / jnp.maximum(n_pd, 1.0))
    kt, kd = jax.random.split(subsample_key)
    samp_t = (jax.random.uniform(kt, (m,)) < target_prob).astype(jnp.float32)
    samp_d = (jax.random.uniform(kd, (m,)) < decoy_prob).astype(jnp.float32)

    w2 = prev_t * samp_t                   # prev target kept by subsample
    dw = prev_d * (1.0 + samp_d)           # 0: not decoy, 1: decoy, 2: decoy+sampled

    # ---- lane-dense history layout + padding ---------------------------------
    r = pl.cdiv(m, _LANES)
    tr_blk = min(_MAX_BLOCK_ROWS, _round_up(r, _SUB))
    r_pad = _round_up(r, tr_blk)
    m_pad = r_pad * _LANES
    pad = m_pad - m
    prev_p = jnp.pad(prev, (0, pad)).reshape(r_pad, _LANES)
    dw_p = jnp.pad(dw, (0, pad)).reshape(r_pad, _LANES)      # padding -> 0 (ignored)
    w2_p = jnp.pad(w2, (0, pad)).reshape(r_pad, _LANES)      # padding -> 0 (ignored)
    grid = (r_pad // tr_blk,)

    # ---- SMEM scalars: margin, has_prev_decoys flag ---------------------------
    scalars = jnp.stack([jnp.asarray(margin, jnp.float32).reshape(()),
                         (n_pd > 0.5).astype(jnp.float32)]).reshape(1, 2)

    kernel = functools.partial(
        _adaptive_rank_loss_kernel,
        inv_max_prev_targets=1.0 / float(max_prev_targets),
        inv_max_prev_decoys=1.0 / float(max_prev_decoys),
    )

    out = pl.pallas_call(
        kernel,
        out_shape=jax.ShapeDtypeStruct((1, 1), jnp.float32),
        grid_spec=pltpu.PrefetchScalarGridSpec(
            num_scalar_prefetch=0,
            grid=grid,
            in_specs=[
                pl.BlockSpec((n, 1), lambda i: (0, 0)),                 # cur scores
                pl.BlockSpec((n, 1), lambda i: (0, 0)),                 # cur target mask
                pl.BlockSpec((1, 2), lambda i: (0, 0),
                             memory_space=pltpu.SMEM),                  # margin, has_decoys
                pl.BlockSpec((tr_blk, _LANES), lambda i: (i, 0)),       # prev scores
                pl.BlockSpec((tr_blk, _LANES), lambda i: (i, 0)),       # packed decoy mask
                pl.BlockSpec((tr_blk, _LANES), lambda i: (i, 0)),       # target*sample mask
            ],
            out_specs=pl.BlockSpec((1, 1), lambda i: (0, 0),
                                   memory_space=pltpu.SMEM),
            scratch_shapes=[
                pltpu.VMEM((n, _SUB, _LANES), jnp.float32),             # acc loss1
                pltpu.VMEM((n, _SUB, _LANES), jnp.float32),             # acc loss2
                pltpu.VMEM((_SUB, _LANES), jnp.float32),                # running decoy max
            ],
        ),
        compiler_params=pltpu.CompilerParams(
            dimension_semantics=("arbitrary",)),
        cost_estimate=pl.CostEstimate(
            flops=int(10 * n * m_pad),
            transcendentals=int(n),
            bytes_accessed=int(12 * m_pad + 8 * n + 16)),
    )(cur, cur_t, scalars, prev_p, dw_p, w2_p)
    return out[0, 0]


def adaptive_rank_loss_ref(current_scores, current_labels, margin,
                           prev_scores, prev_labels, subsample_key,
                           max_prev_targets=MAX_PREV_TARGETS,
                           max_prev_decoys=MAX_PREV_DECOYS):
    """Pure-JAX reference mirroring the PyTorch forward (mask formulation)."""
    cur = current_scores.astype(jnp.float32)
    cur_t = (current_labels.astype(jnp.float32) >= 0.5).astype(jnp.float32)
    prev = prev_scores.astype(jnp.float32)
    prev_t = (prev_labels.astype(jnp.float32) >= 0.5).astype(jnp.float32)
    prev_d = 1.0 - prev_t
    m = prev.shape[0]

    n_pt = jnp.sum(prev_t)
    n_pd = jnp.sum(prev_d)
    target_prob = jnp.minimum(1.0, max_prev_targets / jnp.maximum(n_pt, 1.0))
    decoy_prob = jnp.minimum(1.0, max_prev_decoys / jnp.maximum(n_pd, 1.0))
    kt, kd = jax.random.split(subsample_key)
    samp_t = (jax.random.uniform(kt, (m,)) < target_prob).astype(jnp.float32)
    samp_d = (jax.random.uniform(kd, (m,)) < decoy_prob).astype(jnp.float32)

    max_prev_decoy = jnp.max(jnp.where(prev_d > 0.5, prev, -jnp.inf))
    has_prev_decoys = n_pd > 0.5
    gap = jnp.maximum(cur - max_prev_decoy, 0.0)
    scale = jnp.where(has_prev_decoys, jnp.exp(-gap), jnp.ones_like(gap))

    diff1 = prev[None, :] - cur[:, None] + margin
    l1 = jnp.sum(jnp.maximum(diff1, 0.0) ** 2 * scale[:, None]
                 * (cur_t[:, None] * (prev_d * samp_d)[None, :])) / max_prev_targets
    diff2 = cur[:, None] - prev[None, :] + margin
    l2 = jnp.sum(jnp.maximum(diff2, 0.0) ** 2
                 * ((1.0 - cur_t)[:, None] * (prev_t * samp_t)[None, :])) / max_prev_decoys
    total = l1 + l2
    total = jnp.where(jnp.isnan(total), 0.0, total)

    n_t = jnp.sum(cur_t)
    degenerate = jnp.logical_or(n_t < 0.5, n_t > cur.shape[0] - 0.5)
    return jnp.where(degenerate, jnp.sum(cur) * 1e-9, total)


def _run_case(seed, n_cur, m_prev):
    key = jax.random.PRNGKey(seed)
    k_cur, k_clab, k_prev, k_plab, k_samp = jax.random.split(key, 5)

    current_scores = jax.random.normal(k_cur, (n_cur,), dtype=jnp.float32)
    current_labels = (jax.random.uniform(k_clab, (n_cur,)) > 0.5).astype(jnp.float32)
    # mimic initialize_history: prev_scores = rand * 0.5
    prev_scores = jax.random.uniform(k_prev, (m_prev,), dtype=jnp.float32) * 0.5
    prev_labels = (jax.random.uniform(k_plab, (m_prev,)) > 0.5).astype(jnp.float32)
    margin = jnp.float32(1.0)   # learnable margin parameter, deterministic init

    loss = adaptive_rank_loss(current_scores, current_labels, margin,
                              prev_scores, prev_labels, k_samp)
    jax.block_until_ready(loss)
    loss_ref = adaptive_rank_loss_ref(current_scores, current_labels, margin,
                                      prev_scores, prev_labels, k_samp)
    assert jnp.allclose(loss, loss_ref, rtol=2e-5, atol=1e-6), (loss, loss_ref)
    return loss


if __name__ == "__main__":
    # Single-tile grid with padding (M not a multiple of 128).
    _run_case(seed=0, n_cur=16, m_prev=300)
    # Multi-tile grid (exercises the pipelined reduction across history tiles).
    _run_case(seed=1, n_cur=16, m_prev=40000)
    print("KERNEL_OK")
</pallas_src>

<mosaic_0001>
module attributes {stable_mosaic.version = 11 : i64} {
  func.func @_adaptive_rank_loss_kernel(%arg0: i32, %arg1: memref<16x1xf32, #tpu.memory_space<vmem>>, %arg2: memref<16x1xf32, #tpu.memory_space<vmem>>, %arg3: memref<1x2xf32, #tpu.memory_space<smem>>, %arg4: memref<8x128xf32, #tpu.memory_space<vmem>>, %arg5: memref<8x128xf32, #tpu.memory_space<vmem>>, %arg6: memref<8x128xf32, #tpu.memory_space<vmem>>, %arg7: memref<1x1xf32, #tpu.memory_space<smem>>, %arg8: memref<16x8x128xf32, #tpu.memory_space<vmem>>, %arg9: memref<16x8x128xf32, #tpu.memory_space<vmem>>, %arg10: memref<8x128xf32, #tpu.memory_space<vmem>>) attributes {dimension_semantics = [#tpu.dimension_semantics<arbitrary>], iteration_bounds = array<i64: 1>, scalar_prefetch = 0 : i64, scratch_operands = 3 : i64, tpu.core_type = #tpu.core_type<tc>, window_params = [{pipeline_mode = #tpu.pipeline_mode<synchronous>, transform_indices = @transform_0, window_bounds = array<i64: 16, 1>}, {pipeline_mode = #tpu.pipeline_mode<synchronous>, transform_indices = @transform_1, window_bounds = array<i64: 16, 1>}, {transform_indices = @transform_2, window_bounds = array<i64: 1, 2>}, {transform_indices = @transform_3, window_bounds = array<i64: 8, 128>}, {transform_indices = @transform_4, window_bounds = array<i64: 8, 128>}, {transform_indices = @transform_5, window_bounds = array<i64: 8, 128>}, {transform_indices = @transform_6, window_bounds = array<i64: 1, 1>}]} {
    %c0_i32 = arith.constant 0 : i32
    %0 = arith.cmpi eq, %arg0, %c0_i32 : i32
    %1 = arith.extui %0 : i1 to i32
    %cst = arith.constant -3.000000e+38 : f32
    %c0_i32_0 = arith.constant 0 : i32
    %2 = arith.cmpi ne, %1, %c0_i32_0 : i32
    scf.if %2 {
      %cst_31 = arith.constant 0.000000e+00 : f32
      %58 = vector.broadcast %cst_31 : f32 to vector<16x8x128xf32>
      %c0_32 = arith.constant 0 : index
      %c0_33 = arith.constant 0 : index
      %c0_34 = arith.constant 0 : index
      %59 = vector.load %arg8[%c0_32, %c0_33, %c0_34] : memref<16x8x128xf32, #tpu.memory_space<vmem>>, vector<16x8x128xf32>
      tpu.vector_store %arg8[%c0_32, %c0_33, %c0_34], %58 {strides = array<i32>} : memref<16x8x128xf32, #tpu.memory_space<vmem>>, vector<16x8x128xf32>,
      %cst_35 = arith.constant 0.000000e+00 : f32
      %60 = vector.broadcast %cst_35 : f32 to vector<16x8x128xf32>
      %c0_36 = arith.constant 0 : index
      %c0_37 = arith.constant 0 : index
      %c0_38 = arith.constant 0 : index
      %61 = vector.load %arg9[%c0_36, %c0_37, %c0_38] : memref<16x8x128xf32, #tpu.memory_space<vmem>>, vector<16x8x128xf32>
      tpu.vector_store %arg9[%c0_36, %c0_37, %c0_38], %60 {strides = array<i32>} : memref<16x8x128xf32, #tpu.memory_space<vmem>>, vector<16x8x128xf32>,
      %62 = vector.broadcast %cst : f32 to vector<8x128xf32>
      %c0_39 = arith.constant 0 : index
      %c0_40 = arith.constant 0 : index
      %63 = vector.load %arg10[%c0_39, %c0_40] : memref<8x128xf32, #tpu.memory_space<vmem>>, vector<8x128xf32>
      tpu.vector_store %arg10[%c0_39, %c0_40], %62 {strides = array<i32>} : memref<8x128xf32, #tpu.memory_space<vmem>>, vector<8x128xf32>,
    } else {
    }
    %c0 = arith.constant 0 : index
    %c0_1 = arith.constant 0 : index
    %3 = vector.load %arg1[%c0, %c0_1] : memref<16x1xf32, #tpu.memory_space<vmem>>, vector<16x1xf32>
    %c0_2 = arith.constant 0 : index
    %c0_3 = arith.constant 0 : index
    %4 = memref.load %arg3[%c0_2, %c0_3] : memref<1x2xf32, #tpu.memory_space<smem>>
    %5 = vector.broadcast %4 : f32 to vector<16x1xf32>
    %6 = arith.subf %3, %5 : vector<16x1xf32>
    %7 = vector.shape_cast %6 : vector<16x1xf32> to vector<16x1x1xf32>
    %8 = vector.broadcast %4 : f32 to vector<16x1xf32>
    %9 = arith.addf %3, %8 : vector<16x1xf32>
    %10 = vector.shape_cast %9 : vector<16x1xf32> to vector<16x1x1xf32>
    %cst_4 = arith.constant -3.000000e+38 : f32
    %c0_i32_5 = arith.constant 0 : i32
    %c8_i32 = arith.constant 8 : i32
    %11 = arith.muli %c0_i32_5, %c8_i32 : i32
    %12 = tpu.assume_multiple %11, 8 : i32
    %13 = arith.index_cast %12 : i32 to index
    %c0_6 = arith.constant 0 : index
    %14 = vector.load %arg4[%13, %c0_6] : memref<8x128xf32, #tpu.memory_space<vmem>>, vector<8x128xf32>
    %15 = arith.index_cast %12 : i32 to index
    %c0_7 = arith.constant 0 : index
    %16 = vector.load %arg5[%15, %c0_7] : memref<8x128xf32, #tpu.memory_space<vmem>>, vector<8x128xf32>
    %17 = arith.index_cast %12 : i32 to index
    %c0_8 = arith.constant 0 : index
    %18 = vector.load %arg6[%17, %c0_8] : memref<8x128xf32, #tpu.memory_space<vmem>>, vector<8x128xf32>
    %cst_9 = arith.constant 5.000000e-01 : f32
    %19 = vector.broadcast %cst_9 : f32 to vector<8x128xf32>
    %20 = arith.cmpf ogt, %16, %19 : vector<8x128xf32>
    %cst_10 = arith.constant 1.500000e+00 : f32
    %21 = vector.broadcast %cst_10 : f32 to vector<8x128xf32>
    %22 = arith.cmpf ogt, %16, %21 : vector<8x128xf32>
    %23 = arith.extui %22 : vector<8x128xi1> to vector<8x128xi32>
    %24 = arith.sitofp %23 : vector<8x128xi32> to vector<8x128xf32>
    %c0_11 = arith.constant 0 : index
    %c0_12 = arith.constant 0 : index
    %25 = vector.load %arg10[%c0_11, %c0_12] : memref<8x128xf32, #tpu.memory_space<vmem>>, vector<8x128xf32>
    %26 = vector.broadcast %cst_4 : f32 to vector<8x128xf32>
    %27 = arith.select %20, %14, %26 : vector<8x128xi1>, vector<8x128xf32>
    %28 = arith.maximumf %25, %27 : vector<8x128xf32>
    %c0_13 = arith.constant 0 : index
    %c0_14 = arith.constant 0 : index
    %29 = vector.load %arg10[%c0_13, %c0_14] : memref<8x128xf32, #tpu.memory_space<vmem>>, vector<8x128xf32>
    tpu.vector_store %arg10[%c0_13, %c0_14], %28 {strides = array<i32>} : memref<8x128xf32, #tpu.memory_space<vmem>>, vector<8x128xf32>,
    %30 = vector.shape_cast %14 : vector<8x128xf32> to vector<1x8x128xf32>
    %31 = vector.broadcast %30 : vector<1x8x128xf32> to vector<16x8x128xf32>
    %32 = vector.broadcast %7 : vector<16x1x1xf32> to vector<16x8x128xf32>
    %33 = arith.subf %31, %32 : vector<16x8x128xf32>
    %cst_15 = arith.constant 0.000000e+00 : f32
    %34 = vector.broadcast %cst_15 : f32 to vector<16x8x128xf32>
    %35 = arith.maximumf %33, %34 : vector<16x8x128xf32>
    %c0_16 = arith.constant 0 : index
    %c0_17 = arith.constant 0 : index
    %c0_18 = arith.constant 0 : index
    %36 = vector.load %arg8[%c0_16, %c0_17, %c0_18] : memref<16x8x128xf32, #tpu.memory_space<vmem>>, vector<16x8x128xf32>
    %37 = arith.mulf %35, %35 : vector<16x8x128xf32>
    %38 = vector.shape_cast %24 : vector<8x128xf32> to vector<1x8x128xf32>
    %39 = vector.broadcast %38 : vector<1x8x128xf32> to vector<16x8x128xf32>
    %40 = arith.mulf %37, %39 : vector<16x8x128xf32>
    %41 = arith.addf %36, %40 : vector<16x8x128xf32>
    %c0_19 = arith.constant 0 : index
    %c0_20 = arith.constant 0 : index
    %c0_21 = arith.constant 0 : index
    %42 = vector.load %arg8[%c0_19, %c0_20, %c0_21] : memref<16x8x128xf32, #tpu.memory_space<vmem>>, vector<16x8x128xf32>
    tpu.vector_store %arg8[%c0_19, %c0_20, %c0_21], %41 {strides = array<i32>} : memref<16x8x128xf32, #tpu.memory_space<vmem>>, vector<16x8x128xf32>,
    %43 = vector.broadcast %10 : vector<16x1x1xf32> to vector<16x8x128xf32>
    %44 = vector.broadcast %30 : vector<1x8x128xf32> to vector<16x8x128xf32>
    %45 = arith.subf %43, %44 : vector<16x8x128xf32>
    %cst_22 = arith.constant 0.000000e+00 : f32
    %46 = vector.broadcast %cst_22 : f32 to vector<16x8x128xf32>
    %47 = arith.maximumf %45, %46 : vector<16x8x128xf32>
    %c0_23 = arith.constant 0 : index
    %c0_24 = arith.constant 0 : index
    %c0_25 = arith.constant 0 : index
    %48 = vector.load %arg9[%c0_23, %c0_24, %c0_25] : memref<16x8x128xf32, #tpu.memory_space<vmem>>, vector<16x8x128xf32>
    %49 = arith.mulf %47, %47 : vector<16x8x128xf32>
    %50 = vector.shape_cast %18 : vector<8x128xf32> to vector<1x8x128xf32>
    %51 = vector.broadcast %50 : vector<1x8x128xf32> to vector<16x8x128xf32>
    %52 = arith.mulf %49, %51 : vector<16x8x128xf32>
    %53 = arith.addf %48, %52 : vector<16x8x128xf32>
    %c0_26 = arith.constant 0 : index
    %c0_27 = arith.constant 0 : index
    %c0_28 = arith.constant 0 : index
    %54 = vector.load %arg9[%c0_26, %c0_27, %c0_28] : memref<16x8x128xf32, #tpu.memory_space<vmem>>, vector<16x8x128xf32>
    tpu.vector_store %arg9[%c0_26, %c0_27, %c0_28], %53 {strides = array<i32>} : memref<16x8x128xf32, #tpu.memory_space<vmem>>, vector<16x8x128xf32>,
    %c1_i32 = arith.constant 1 : i32
    %c0_i32_29 = arith.constant 0 : i32
    %55 = arith.cmpi eq, %arg0, %c0_i32_29 : i32
    %56 = arith.extui %55 : i1 to i32
    %c0_i32_30 = arith.constant 0 : i32
    %57 = arith.cmpi ne, %56, %c0_i32_30 : i32
    scf.if %57 {
      %c0_31 = arith.constant 0 : index
      %c0_32 = arith.constant 0 : index
      %58 = vector.load %arg2[%c0_31, %c0_32] : memref<16x1xf32, #tpu.memory_space<vmem>>, vector<16x1xf32>
      %cst_33 = arith.constant 1.000000e+00 : f32
      %59 = vector.broadcast %cst_33 : f32 to vector<16x1xf32>
      %60 = arith.subf %59, %58 : vector<16x1xf32>
      %c0_34 = arith.constant 0 : index
      %c1 = arith.constant 1 : index
      %61 = memref.load %arg3[%c0_34, %c1] : memref<1x2xf32, #tpu.memory_space<smem>>
      %cst_35 = arith.constant 5.000000e-01 : f32
      %62 = arith.cmpf ogt, %61, %cst_35 : f32
      %c0_36 = arith.constant 0 : index
      %c0_37 = arith.constant 0 : index
      %63 = vector.load %arg10[%c0_36, %c0_37] : memref<8x128xf32, #tpu.memory_space<vmem>>, vector<8x128xf32>
      %64 = vector.shape_cast %63 : vector<8x128xf32> to vector<1x8x128xf32>
      %cst_38 = arith.constant dense<0xFF800000> : vector<1xf32>
      %65 = vector.multi_reduction <maximumf>, %64, %cst_38 [1, 2] : vector<1x8x128xf32> to vector<1xf32>
      %66 = vector.shape_cast %65 : vector<1xf32> to vector<1x1x1xf32>
      %67 = vector.extract %66[0, 0, 0] : f32 from vector<1x1x1xf32>
      %68 = vector.broadcast %67 : f32 to vector<16x1xf32>
      %69 = arith.subf %3, %68 : vector<16x1xf32>
      %cst_39 = arith.constant 0.000000e+00 : f32
      %70 = vector.broadcast %cst_39 : f32 to vector<16x1xf32>
      %71 = arith.maximumf %69, %70 : vector<16x1xf32>
      %cst_40 = arith.constant 0.000000e+00 : f32
      %72 = vector.broadcast %cst_40 : f32 to vector<16x1xf32>
      %73 = arith.subf %72, %71 : vector<16x1xf32>
      %74 = math.exp %73 : vector<16x1xf32>
      %cst_41 = arith.constant 1.000000e+00 : f32
      %75 = vector.broadcast %cst_41 : f32 to vector<16x1xf32>
      %76 = arith.select %62, %74, %75 : vector<16x1xf32>
      %c0_42 = arith.constant 0 : index
      %c0_43 = arith.constant 0 : index
      %c0_44 = arith.constant 0 : index
      %77 = vector.load %arg8[%c0_42, %c0_43, %c0_44] : memref<16x8x128xf32, #tpu.memory_space<vmem>>, vector<16x8x128xf32>
      %cst_45 = arith.constant dense<0.000000e+00> : vector<16x8xf32>
      %78 = vector.multi_reduction <add>, %77, %cst_45 [2] : vector<16x8x128xf32> to vector<16x8xf32>
      %cst_46 = arith.constant dense<0.000000e+00> : vector<16xf32>
      %79 = vector.multi_reduction <add>, %78, %cst_46 [1] : vector<16x8xf32> to vector<16xf32>
      %80 = vector.shape_cast %79 : vector<16xf32> to vector<16x1xf32>
      %c0_47 = arith.constant 0 : index
      %c0_48 = arith.constant 0 : index
      %c0_49 = arith.constant 0 : index
      %81 = vector.load %arg9[%c0_47, %c0_48, %c0_49] : memref<16x8x128xf32, #tpu.memory_space<vmem>>, vector<16x8x128xf32>
      %cst_50 = arith.constant dense<0.000000e+00> : vector<16x8xf32>
      %82 = vector.multi_reduction <add>, %81, %cst_50 [2] : vector<16x8x128xf32> to vector<16x8xf32>
      %cst_51 = arith.constant dense<0.000000e+00> : vector<16xf32>
      %83 = vector.multi_reduction <add>, %82, %cst_51 [1] : vector<16x8xf32> to vector<16xf32>
      %84 = vector.shape_cast %83 : vector<16xf32> to vector<16x1xf32>
      %85 = arith.mulf %80, %58 : vector<16x1xf32>
      %86 = arith.mulf %85, %76 : vector<16x1xf32>
      %87 = vector.shape_cast %86 : vector<16x1xf32> to vector<1x16x1xf32>
      %cst_52 = arith.constant dense<0.000000e+00> : vector<1xf32>
      %88 = vector.multi_reduction <add>, %87, %cst_52 [1, 2] : vector<1x16x1xf32> to vector<1xf32>
      %89 = vector.shape_cast %88 : vector<1xf32> to vector<1x1x1xf32>
      %90 = vector.extract %89[0, 0, 0] : f32 from vector<1x1x1xf32>
      %cst_53 = arith.constant 9.99999974E-5 : f32
      %91 = arith.mulf %90, %cst_53 : f32
      %92 = arith.mulf %84, %60 : vector<16x1xf32>
      %93 = vector.shape_cast %92 : vector<16x1xf32> to vector<1x16x1xf32>
      %cst_54 = arith.constant dense<0.000000e+00> : vector<1xf32>
      %94 = vector.multi_reduction <add>, %93, %cst_54 [1, 2] : vector<1x16x1xf32> to vector<1xf32>
      %95 = vector.shape_cast %94 : vector<1xf32> to vector<1x1x1xf32>
      %96 = vector.extract %95[0, 0, 0] : f32 from vector<1x1x1xf32>
      %cst_55 = arith.constant 9.99999974E-5 : f32
      %97 = arith.mulf %96, %cst_55 : f32
      %98 = arith.addf %91, %97 : f32
      %99 = arith.cmpf one, %98, %98 : f32
      %cst_56 = arith.constant 0.000000e+00 : f32
      %100 = arith.select %99, %cst_56, %98 : f32
      %101 = vector.shape_cast %58 : vector<16x1xf32> to vector<1x16x1xf32>
      %cst_57 = arith.constant dense<0.000000e+00> : vector<1xf32>
      %102 = vector.multi_reduction <add>, %101, %cst_57 [1, 2] : vector<1x16x1xf32> to vector<1xf32>
      %103 = vector.shape_cast %102 : vector<1xf32> to vector<1x1x1xf32>
      %104 = vector.extract %103[0, 0, 0] : f32 from vector<1x1x1xf32>
      %cst_58 = arith.constant 5.000000e-01 : f32
      %105 = arith.cmpf olt, %104, %cst_58 : f32
      %cst_59 = arith.constant 1.600000e+01 : f32
      %cst_60 = arith.constant 5.000000e-01 : f32
      %106 = arith.subf %cst_59, %cst_60 : f32
      %107 = arith.cmpf ogt, %104, %106 : f32
      %108 = arith.ori %105, %107 : i1
      %109 = vector.shape_cast %3 : vector<16x1xf32> to vector<1x16x1xf32>
      %cst_61 = arith.constant dense<0.000000e+00> : vector<1xf32>
      %110 = vector.multi_reduction <add>, %109, %cst_61 [1, 2] : vector<1x16x1xf32> to vector<1xf32>
      %111 = vector.shape_cast %110 : vector<1xf32> to vector<1x1x1xf32>
      %112 = vector.extract %111[0, 0, 0] : f32 from vector<1x1x1xf32>
      %cst_62 = arith.constant 9.99999971E-10 : f32
      %113 = arith.mulf %112, %cst_62 : f32
      %114 = arith.select %108, %113, %100 : f32
      %c0_63 = arith.constant 0 : index
      %c0_64 = arith.constant 0 : index
      %115 = memref.load %arg7[%c0_63, %c0_64] : memref<1x1xf32, #tpu.memory_space<smem>>
      memref.store %114, %arg7[%c0_63, %c0_64] : memref<1x1xf32, #tpu.memory_space<smem>>
    } else {
    }
    return
  }
  func.func @transform_0(%arg0: i32) -> (i32, i32) {
    %c0_i32 = arith.constant 0 : i32
    %c0_i32_0 = arith.constant 0 : i32
    %c0_i32_1 = arith.constant 0 : i32
    return %c0_i32, %c0_i32_0 : i32, i32
  }
  func.func @transform_1(%arg0: i32) -> (i32, i32) {
    %c0_i32 = arith.constant 0 : i32
    %c0_i32_0 = arith.constant 0 : i32
    %c0_i32_1 = arith.constant 0 : i32
    return %c0_i32, %c0_i32_0 : i32, i32
  }
  func.func @transform_2(%arg0: i32) -> (i32, i32) {
    %c0_i32 = arith.constant 0 : i32
    %c0_i32_0 = arith.constant 0 : i32
    %c0_i32_1 = arith.constant 0 : i32
    return %c0_i32, %c0_i32_0 : i32, i32
  }
  func.func @transform_3(%arg0: i32) -> (i32, i32) {
    %c0_i32 = arith.constant 0 : i32
    %c0_i32_0 = arith.constant 0 : i32
    return %arg0, %c0_i32 : i32, i32
  }
  func.func @transform_4(%arg0: i32) -> (i32, i32) {
    %c0_i32 = arith.constant 0 : i32
    %c0_i32_0 = arith.constant 0 : i32
    return %arg0, %c0_i32 : i32, i32
  }
  func.func @transform_5(%arg0: i32) -> (i32, i32) {
    %c0_i32 = arith.constant 0 : i32
    %c0_i32_0 = arith.constant 0 : i32
    return %arg0, %c0_i32 : i32, i32
  }
  func.func @transform_6(%arg0: i32) -> (i32, i32) {
    %c0_i32 = arith.constant 0 : i32
    %c0_i32_0 = arith.constant 0 : i32
    %c0_i32_1 = arith.constant 0 : i32
    return %c0_i32, %c0_i32_0 : i32, i32
  }
}

</mosaic_0001>

<bundles_post_ra>
// kernel: tpu_custom_call.1
= control target key start
LH: loop header
LB: loop body
LE: loop exit
PB: predicated region body
PF: predicated region fallthrough
CT: control target
= control target key end

     0   :  { %11 = vsyncpa [#allocation7], 0  ;;  %s1566_s0 = inlined_call_operand.vmem [shape: f32[16,1], index: 0, kind: input, shape index: {}]   ;;  %s1567_s1 = inlined_call_operand.vmem [shape: f32[16,1], index: 1, kind: input, shape index: {}]   ;;  %s1568_s2 = inlined_call_operand.vmem [shape: f32[1,2], index: 2, kind: input, shape index: {}]   ;;  %s1569_s3 = inlined_call_operand.vmem [shape: f32[8,128], index: 3, kind: input, shape index: {}]   ;;  %s1570_s4 = inlined_call_operand.vmem [shape: f32[8,128], index: 4, kind: input, shape index: {}]   ;;  %s1571_s5 = inlined_call_operand.vmem [shape: f32[8,128], index: 5, kind: input, shape index: {}]   ;;  %s1572_s6 = inlined_call_operand.hbm [shape: f32[1,1], index: 6, kind: output, shape index: {}]  }
   0x1   :  { %12 = vsyncpa [#allocation6], 0  ;;  %s23_s23 = sshll.u32 %s1568_s2, 4  ;;  %s24_s23 = int_to_ptr.vmem [resolvable:$true] %s23_s23 }
   0x2   :  { %s1222_s24 = scalar_lea.vmem %s24_s23, 16  ;;  %p1227_p1 = scmp.lt.s32.totalorder %s24_s23, %s24_s23 }
   0x3   :  { %p1223_p0 = scmp.ne.s32.totalorder %s24_s23, %s1222_s24  ;;  %p1228_p2 = scmp.lt.s32.totalorder %s1222_s24, %s1222_s24 }
   0x5   :  { %p1229_p3 = por %p1228_p2, %p1227_p1 }
   0x7   :  { %p1230_p4 = pnand %p1229_p3, %p1223_p0 }
   0x9   :  { %1233 = shalt.err (!%p1230_p4)
}
   0xa   :  { %s1248_s25 = smov [#allocation5]  }
   0xb   :  { %26 = dma.vmem_to_smem %s24_s23, 16, %s1248_s25, [#allocation7]  }
   0xc   :  { %1244 = dma.done.wait [#allocation7], 16  }
   0xd   :  { %1245 = vsyncadd [#allocation7], 4294967280 }
   0xe   :  { %36 = sfence }
   0xf   :  { %s76_s26 = sld [smem:[#allocation5]]  ;;  %v86_v0 = vlaneseq  ;;  %v1249_v1 = vmov 0   ;;  %v1250_v2 = vmov 1966171168   ;;  %v1294_v7 = vld [vmem:[%s1566_s0 + $0x8] sm:$0xff]  ;;  %v1301_v9 = vld [vmem:[%s1566_s0] sm:$0xff] }
  0x10   :  { %1217 = vset.pattern.permute.xlu1 %v1249_v1  ;;  %1216 = vset.pattern.permute.xlu0 %v1249_v1  ;;  %v84_v3 = vunpack.c.l.s4 %v1250_v2  ;;  %vm938_vm2 = vcmask 1041409   ;;  %vm940_vm3 = vcmask 1042434   ;;  %vm942_vm4 = vcmask 1043459   ;;  %s1200_s9 = sld [smem:[#allocation5 + $0x1]]  ;;  %s1234_s24 = scalar_lea.hbm %s1572_s6, 16 }
  0x11   :  { %v87_v4 = vshrl.u32 %v86_v0, 7  ;;  %v873_v5 = vand.u32 127, %v86_v0  ;;  %vm944_vm5 = vcmask 1044484   ;;  %vm946_vm6 = vcmask 1045509   ;;  %p1235_p10 = scmp.ne.s32.totalorder %s1572_s6, %s1234_s24  ;;  %p1238_p11 = scmp.lt.u32.totalorder %s1234_s24, %s1572_s6 }
  0x12   :  { %v85_v6 = vunpack.c.0.s8 %v84_v3  ;;  %vm948_vm7 = vcmask 1046534   ;;  %vm950_vm8 = vcmask 1047559   ;;  %vm961_vm9 = vcmask 64512  }
  0x13   :  { %v1296_v8 = vsub.s32 %v873_v5, %v87_v4  ;;  %v1311_v16 = vsub.s32 0, %v87_v4  ;;  %vm1122_vm11 = vcmask 7168   ;;  %p1240_p12 = pnand %p1238_p11, %p1235_p10 }
  0x14   :  { %v1303_v10 = vsub.s32 %v85_v6, %v87_v4 }
  0x15   :  { %v77_v11 = vstv %s76_s26 }
  0x16   :  { %v79_v12 = vsub.f32 %v1294_v7, %v77_v11  ;;  %v78_v13 = vsub.f32 %v1301_v9, %v77_v11  ;;  %v1308_v14 = vadd.f32 %v77_v11, %v1301_v9  ;;  %v1323_v28 = vadd.f32 %v77_v11, %v1294_v7  ;;  %p781_p5 = scmp.gt.f32.partialorder %s1200_s9, 0.5 }
  0x18   :  { %v138_v15 = vrot.slane %v79_v12, %v1303_v10  ;;  %v89_v17 = vrot.slane %v78_v13, %v1303_v10  ;;  %v191_v18 = vrot.slane %v1308_v14, %v1303_v10  ;;  %v240_v34 = vrot.slane %v1323_v28, %v1303_v10  ;;  %s803_s10 = scalar_select %p781_p5, 1, 0 }
  0x19   :  { %v131_v38 = vcombine.high %v79_v12, %v79_v12  ;;  %v82_v39 = vcombine.high %v78_v13, %v78_v13  ;;  %v233_v2 = vcombine.high %v1323_v28, %v1323_v28  ;;  %v184_v3 = vcombine.high %v1308_v14, %v1308_v14 }
  0x1a   :  { %v154_v19 = vrot.slane %v138_v15, %v1303_v10  ;;  %v146_v20 = vcombine.high %v138_v15, %v138_v15  ;;  %v105_v21 = vrot.slane %v89_v17, %v1303_v10  ;;  %v97_v22 = vcombine.high %v89_v17, %v89_v17 }
  0x1b   :  { %v207_v23 = vrot.slane %v191_v18, %v1303_v10  ;;  %v199_v27 = vcombine.high %v191_v18, %v191_v18  ;;  %v248_v41 = vcombine.high %v240_v34, %v240_v34  ;;  %v256_v46 = vrot.slane %v240_v34, %v1303_v10 }
  0x1c   :  { %v328_v24 = vrot.slane %v154_v19, %v1311_v16  ;;  %v296_v25 = vrot.slane %v105_v21, %v1311_v16  ;;  %v168_v26 = vrot.slane %v146_v20, %v1303_v10  ;;  %v176_v29 = vcombine.high %v154_v19, %v154_v19 }
  0x1d   :  { %v536_v30 = vrot.slane %v207_v23, %v1311_v16  ;;  %v119_v31 = vrot.slane %v97_v22, %v1303_v10  ;;  %v127_v33 = vcombine.high %v105_v21, %v105_v21  ;;  %v221_v37 = vrot.slane %v199_v27, %v1303_v10 }
  0x1e   :  { %390 = vperm.xlu1 %1217, %v328_v24   ;;  %358 = vperm.xlu0 %1216, %v296_v25   ;;  %v332_v32 = vrot.slane %v168_v26, %v1311_v16  ;;  %v336_v35 = vrot.slane %v176_v29, %v1311_v16  ;;  %v178_v43 = vcombine.high %v168_v26, %v168_v26 }
  0x1f   :  { %v300_v36 = vrot.slane %v119_v31, %v1311_v16  ;;  %v304_v40 = vrot.slane %v127_v33, %v1311_v16  ;;  %v540_v42 = vrot.slane %v221_v37, %v1311_v16  ;;  %v129_v44 = vcombine.high %v119_v31, %v119_v31 }
  0x20   :  { %v270_v45 = vrot.slane %v248_v41, %v1303_v10  ;;  %v145_v47 = vrot.slane %v131_v38, %v1303_v10  ;;  %v340_v48 = vrot.slane %v178_v43, %v1311_v16  ;;  %v96_v50 = vrot.slane %v82_v39, %v1303_v10  ;;  %v283_v41 = vld [vmem:[%s1570_s4] sm:$0xff] }
  0x21   :  { %v308_v49 = vrot.slane %v129_v44, %v1311_v16  ;;  %v568_v52 = vrot.slane %v256_v46, %v1311_v16  ;;  %v278_v55 = vcombine.high %v256_v46, %v256_v46  ;;  %v229_v56 = vcombine.high %v207_v23, %v207_v23 }
  0x22   :  { %394 = vperm.xlu1 %1217, %v332_v32   ;;  %598 = vperm.xlu0 %1216, %v536_v30   ;;  %v572_v51 = vrot.slane %v270_v45, %v1311_v16  ;;  %v161_v53 = vrot.slane %v145_v47, %v1303_v10  ;;  %v112_v54 = vrot.slane %v96_v50, %v1303_v10  ;;  %vm285_vm0 = vcmp.gt.f32.partialorder %v283_v41, 0.5 }
  0x23   :  { %v147_v57 = vcombine.high %v145_v47, %v145_v47  ;;  %v98_v60 = vcombine.high %v96_v50, %v96_v50  ;;  %v576_v61 = vrot.slane %v278_v55, %v1311_v16  ;;  %v544_v62 = vrot.slane %v229_v56, %v1311_v16 }
  0x24   :  { %v344_v58 = vrot.slane %v161_v53, %v1311_v16  ;;  %v312_v59 = vrot.slane %v112_v54, %v1311_v16  ;;  %v280_v1 = vcombine.high %v270_v45, %v270_v45  ;;  %v231_v6 = vcombine.high %v221_v37, %v221_v37 }
  0x25   :  { %v175_v63 = vrot.slane %v147_v57, %v1303_v10  ;;  %v126_v0 = vrot.slane %v98_v60, %v1303_v10  ;;  %v177_v12 = vcombine.high %v161_v53, %v161_v53  ;;  %v128_v13 = vcombine.high %v112_v54, %v112_v54 }
  0x26   :  { %398 = vperm.xlu1 %1217, %v336_v35   ;;  %362 = vperm.xlu0 %1216, %v300_v36   ;;  %v580_v11 = vrot.slane %v280_v1, %v1311_v16  ;;  %v548_v15 = vrot.slane %v231_v6, %v1311_v16  ;;  %v247_v17 = vrot.slane %v233_v2, %v1303_v10  ;;  %vm286_vm1 = vcmp.gt.f32.partialorder %v283_v41, 1.5 }
  0x27   :  { %v348_v4 = vrot.slane %v175_v63, %v1311_v16  ;;  %v316_v5 = vrot.slane %v126_v0, %v1311_v16  ;;  %v198_v18 = vrot.slane %v184_v3, %v1303_v10  ;;  %v352_v14 = vrot.slane %v177_v12, %v1311_v16 }
  0x28   :  { %v320_v19 = vrot.slane %v128_v13, %v1311_v16  ;;  %v263_v20 = vrot.slane %v247_v17, %v1303_v10  ;;  %v179_v22 = vcombine.high %v175_v63, %v175_v63  ;;  %v130_v23 = vcombine.high %v126_v0, %v126_v0 }
  0x29   :  { %v214_v21 = vrot.slane %v198_v18, %v1303_v10  ;;  %v249_v24 = vcombine.high %v247_v17, %v247_v17  ;;  %v200_v27 = vcombine.high %v198_v18, %v198_v18 }
  0x2a   :  { %602 = vperm.xlu1 %1217, %v540_v42   ;;  %366 = vperm.xlu0 %1216, %v304_v40   ;;  %v584_v25 = vrot.slane %v263_v20, %v1311_v16  ;;  %v356_v28 = vrot.slane %v179_v22, %v1311_v16  ;;  %v324_v29 = vrot.slane %v130_v23, %v1311_v16  ;;  %v1383_v42 = vld [vmem:[%s1569_s3] sm:$0xff] }
  0x2b   :  { %v552_v26 = vrot.slane %v214_v21, %v1311_v16  ;;  %v277_v30 = vrot.slane %v249_v24, %v1303_v10  ;;  %v228_v31 = vrot.slane %v200_v27, %v1303_v10  ;;  %v279_v32 = vcombine.high %v263_v20, %v263_v20 }
  0x2c   :  { %v230_v35 = vcombine.high %v214_v21, %v214_v21  ;;  %v290_v43 = vsel %vm285_vm0, %v1383_v42, -3e+38 }
  0x2d   :  { %v588_v33 = vrot.slane %v277_v30, %v1311_v16  ;;  %v556_v34 = vrot.slane %v228_v31, %v1311_v16  ;;  %v592_v36 = vrot.slane %v279_v32, %v1311_v16  ;;  %v281_v38 = vcombine.high %v277_v30, %v277_v30 }
  0x2e   :  { %402 = vperm.xlu1 %1217, %v340_v48   ;;  %370 = vperm.xlu0 %1216, %v308_v49   ;;  %v560_v37 = vrot.slane %v230_v35, %v1311_v16  ;;  %v232_v39 = vcombine.high %v228_v31, %v228_v31  ;;  %v291_v44 = vmax.f32 %v290_v43, -3e+38 }
  0x2f   :  { %v596_v10 = vrot.slane %v281_v38, %v1311_v16 }
  0x30   :  { %v564_v40 = vrot.slane %v232_v39, %v1311_v16 }
  0x32   :  { %634 = vperm.xlu1 %1217, %v572_v51   ;;  %630 = vperm.xlu0 %1216, %v568_v52   ;;  %v1251_v52 = vmov 0.0  }
  0x33   :  { %v1388_v53 = vsel %vm286_vm1, 1.0, %v1251_v52 }
  0x36   :  { %406 = vperm.xlu1 %1217, %v344_v58   ;;  %374 = vperm.xlu0 %1216, %v312_v59  }
  0x3a   :  { %638 = vperm.xlu1 %1217, %v576_v61   ;;  %606 = vperm.xlu0 %1216, %v544_v62  }
  0x3e   :  { %410 = vperm.xlu1 %1217, %v348_v4   ;;  %378 = vperm.xlu0 %1216, %v316_v5  }
  0x42   :  { %642 = vperm.xlu1 %1217, %v580_v11   ;;  %610 = vperm.xlu0 %1216, %v548_v15   ;;  %v1399_v11 = vld [vmem:[%s1571_s5] sm:$0xff] }
  0x46   :  { %414 = vperm.xlu1 %1217, %v352_v14   ;;  %382 = vperm.xlu0 %1216, %v320_v19  }
  0x4a   :  { %646 = vperm.xlu1 %1217, %v584_v25   ;;  %614 = vperm.xlu0 %1216, %v552_v26  }
  0x4e   :  { %418 = vperm.xlu1 %1217, %v356_v28   ;;  %386 = vperm.xlu0 %1216, %v324_v29  }
  0x52   :  { %650 = vperm.xlu1 %1217, %v588_v33   ;;  %618 = vperm.xlu0 %1216, %v556_v34  }
  0x56   :  { %654 = vperm.xlu1 %1217, %v592_v36   ;;  %622 = vperm.xlu0 %1216, %v560_v37  }
  0x5a   :  { %658 = vperm.xlu1 %1217, %v596_v10   ;;  %626 = vperm.xlu0 %1216, %v564_v40  }
  0x7e   :  { %783 = vmax.xlane.f32.xlu1 %v291_v44 }
  0x9d   :  { %v391_v45 = vpop.permute.xlu1 %390  ;;  %v359_v46 = vpop.permute.xlu0 %358 }
  0x9e   :  { %v429_v16 = vsub.f32 %v1383_v42, %v391_v45  ;;  %v421_v47 = vsub.f32 %v1383_v42, %v359_v46 }
  0xa0   :  { %v445_v48 = vmax.f32 %v429_v16, 0.0  ;;  %v437_v49 = vmax.f32 %v421_v47, 0.0 }
  0xa1   :  { %v395_v50 = vpop.permute.xlu1 %394  ;;  %v599_v51 = vpop.permute.xlu0 %598 }
  0xa2   :  { %v469_v54 = vmul.f32 %v437_v49, %v437_v49  ;;  %v661_v55 = vsub.f32 %v599_v51, %v1383_v42  ;;  %v477_v56 = vmul.f32 %v445_v48, %v445_v48  ;;  %v430_v21 = vsub.f32 %v1383_v42, %v395_v50 }
  0xa4   :  { %v485_v57 = vmul.f32 %v1388_v53, %v469_v54  ;;  %v677_v58 = vmax.f32 %v661_v55, 0.0  ;;  %v493_v1 = vmul.f32 %v1388_v53, %v477_v56  ;;  %v446_v29 = vmax.f32 %v430_v21, 0.0 }
  0xa5   :  { %v399_v59 = vpop.permute.xlu1 %398  ;;  %v363_v60 = vpop.permute.xlu0 %362 }
  0xa6   :  { %v431_v61 = vsub.f32 %v1383_v42, %v399_v59  ;;  %v422_v62 = vsub.f32 %v1383_v42, %v363_v60  ;;  %824 = vadd.xlane.f32.xlu0 %v485_v57  ;;  %v709_v2 = vmul.f32 %v677_v58, %v677_v58  ;;  %v478_v39 = vmul.f32 %v446_v29, %v446_v29 }
  0xa8   :  { %v447_v63 = vmax.f32 %v431_v61, 0.0  ;;  %v438_v0 = vmax.f32 %v422_v62, 0.0  ;;  %v725_v14 = vmul.f32 %v709_v2, %v1399_v11  ;;  %v494_v52 = vmul.f32 %v1388_v53, %v478_v39 }
  0xa9   :  { %v603_v3 = vpop.permute.xlu1 %602  ;;  %v367_v4 = vpop.permute.xlu0 %366 }
  0xaa   :  { %v470_v5 = vmul.f32 %v438_v0, %v438_v0  ;;  %v662_v6 = vsub.f32 %v603_v3, %v1383_v42  ;;  %840 = vadd.xlane.f32.xlu0 %v493_v1  ;;  %v479_v12 = vmul.f32 %v447_v63, %v447_v63  ;;  %v423_v30 = vsub.f32 %v1383_v42, %v367_v4 }
  0xac   :  { %v678_v13 = vmax.f32 %v662_v6, 0.0  ;;  %v486_v15 = vmul.f32 %v1388_v53, %v470_v5  ;;  %v495_v20 = vmul.f32 %v1388_v53, %v479_v12  ;;  %v439_v10 = vmax.f32 %v423_v30, 0.0 }
  0xad   :  { %v1402_v17 = vpop.permute.xlu1 %402  ;;  %v1404_v18 = vpop.permute.xlu0 %370 }
  0xae   :  { %826 = vadd.xlane.f32.xlu1 %v486_v15  ;;  %984 = vadd.xlane.f32.xlu0 %v725_v14  ;;  %v710_v19 = vmul.f32 %v678_v13, %v678_v13  ;;  %v471_v47 = vmul.f32 %v439_v10, %v439_v10  ;;  %v432_v1 = vsub.f32 %v1383_v42, %v1402_v17 }
  0xaf   :  { %v424_v2 = vsub.f32 %v1383_v42, %v1404_v18 }
  0xb0   :  { %v726_v28 = vmul.f32 %v710_v19, %v1399_v11  ;;  %v487_v60 = vmul.f32 %v1388_v53, %v471_v47  ;;  %v448_v13 = vmax.f32 %v432_v1, 0.0 }
  0xb1   :  { %v635_v22 = vpop.permute.xlu1 %634  ;;  %v631_v23 = vpop.permute.xlu0 %630 }
  0xb2   :  { %v670_v24 = vsub.f32 %v635_v22, %v1383_v42  ;;  %v669_v25 = vsub.f32 %v631_v23, %v1383_v42  ;;  %844 = vadd.xlane.f32.xlu1 %v495_v20  ;;  %v440_v20 = vmax.f32 %v424_v2, 0.0 }
  0xb4   :  { %v686_v26 = vmax.f32 %v670_v24, 0.0  ;;  %v685_v27 = vmax.f32 %v669_v25, 0.0  ;;  %v480_v24 = vmul.f32 %v448_v13, %v448_v13  ;;  %v472_v29 = vmul.f32 %v440_v20, %v440_v20 }
  0xb5   :  { %v407_v31 = vpop.permute.xlu1 %406  ;;  %v375_v32 = vpop.permute.xlu0 %374 }
  0xb6   :  { %v718_v33 = vmul.f32 %v686_v26, %v686_v26  ;;  %v717_v34 = vmul.f32 %v685_v27, %v685_v27  ;;  %v433_v35 = vsub.f32 %v1383_v42, %v407_v31  ;;  %986 = vadd.xlane.f32.xlu1 %v726_v28  ;;  %v425_v40 = vsub.f32 %v1383_v42, %v375_v32 }
  0xb8   :  { %v449_v36 = vmax.f32 %v433_v35, 0.0  ;;  %v734_v37 = vmul.f32 %v718_v33, %v1399_v11  ;;  %v733_v38 = vmul.f32 %v717_v34, %v1399_v11  ;;  %v441_v48 = vmax.f32 %v425_v40, 0.0 }
  0xb9   :  { %v639_v41 = vpop.permute.xlu1 %638  ;;  %v607_v43 = vpop.permute.xlu0 %606  ;;  %v488_v40 = vmul.f32 %v1388_v53, %v472_v29 }
  0xba   :  { %v481_v44 = vmul.f32 %v449_v36, %v449_v36  ;;  %v671_v45 = vsub.f32 %v639_v41, %v1383_v42  ;;  %1002 = vadd.xlane.f32.xlu1 %v734_v37  ;;  %1000 = vadd.xlane.f32.xlu0 %v733_v38  ;;  %v663_v49 = vsub.f32 %v607_v43, %v1383_v42 }
  0xbb   :  { %v473_v56 = vmul.f32 %v441_v48, %v441_v48  ;;  %v496_v37 = vmul.f32 %v1388_v53, %v480_v24 }
  0xbc   :  { %v687_v46 = vmax.f32 %v671_v45, 0.0  ;;  %v497_v16 = vmul.f32 %v1388_v53, %v481_v44  ;;  %v679_v57 = vmax.f32 %v663_v49, 0.0 }
  0xbd   :  { %v411_v50 = vpop.permute.xlu1 %410  ;;  %v379_v51 = vpop.permute.xlu0 %378  ;;  %v489_v0 = vmul.f32 %v1388_v53, %v473_v56 }
  0xbe   :  { %v719_v54 = vmul.f32 %v687_v46, %v687_v46  ;;  %848 = vadd.xlane.f32.xlu1 %v497_v16  ;;  %842 = vadd.xlane.f32.xlu0 %v494_v52  ;;  %v711_v61 = vmul.f32 %v679_v57, %v679_v57  ;;  %v434_v15 = vsub.f32 %v1383_v42, %v411_v50 }
  0xbf   :  { %v426_v17 = vsub.f32 %v1383_v42, %v379_v51 }
  0xc0   :  { %v735_v55 = vmul.f32 %v719_v54, %v1399_v11  ;;  %v727_v5 = vmul.f32 %v711_v61, %v1399_v11  ;;  %v450_v25 = vmax.f32 %v434_v15, 0.0 }
  0xc1   :  { %v643_v58 = vpop.permute.xlu1 %642  ;;  %v611_v59 = vpop.permute.xlu0 %610  ;;  %v442_v30 = vmax.f32 %v426_v17, 0.0 }
  0xc2   :  { %1004 = vadd.xlane.f32.xlu1 %v735_v55  ;;  %828 = vadd.xlane.f32.xlu0 %v487_v60  ;;  %v672_v26 = vsub.f32 %v643_v58, %v1383_v42  ;;  %v664_v31 = vsub.f32 %v611_v59, %v1383_v42  ;;  %v482_v33 = vmul.f32 %v450_v25, %v450_v25 }
  0xc3   :  { %v474_v38 = vmul.f32 %v442_v30, %v442_v30 }
  0xc4   :  { %v688_v34 = vmax.f32 %v672_v26, 0.0  ;;  %v680_v39 = vmax.f32 %v664_v31, 0.0  ;;  %v498_v45 = vmul.f32 %v1388_v53, %v482_v33 }
  0xc5   :  { %v415_v62 = vpop.permute.xlu1 %414  ;;  %v383_v63 = vpop.permute.xlu0 %382  ;;  %v490_v49 = vmul.f32 %v1388_v53, %v474_v38 }
  0xc6   :  { %832 = vadd.xlane.f32.xlu0 %v489_v0  ;;  %v435_v35 = vsub.f32 %v1383_v42, %v415_v62  ;;  %v427_v10 = vsub.f32 %v1383_v42, %v383_v63  ;;  %v720_v41 = vmul.f32 %v688_v34, %v688_v34  ;;  %v712_v46 = vmul.f32 %v680_v39, %v680_v39 }
  0xc8   :  { %v451_v43 = vmax.f32 %v435_v35, 0.0  ;;  %v443_v16 = vmax.f32 %v427_v10, 0.0  ;;  %v736_v55 = vmul.f32 %v720_v41, %v1399_v11  ;;  %v728_v59 = vmul.f32 %v712_v46, %v1399_v11 }
  0xc9   :  { %v647_v3 = vpop.permute.xlu1 %646  ;;  %v615_v4 = vpop.permute.xlu0 %614 }
  0xca   :  { %v673_v6 = vsub.f32 %v647_v3, %v1383_v42  ;;  %v665_v12 = vsub.f32 %v615_v4, %v1383_v42  ;;  %988 = vadd.xlane.f32.xlu0 %v727_v5  ;;  %v483_v51 = vmul.f32 %v451_v43, %v451_v43  ;;  %v475_v56 = vmul.f32 %v443_v16, %v443_v16 }
  0xcc   :  { %v689_v14 = vmax.f32 %v673_v6, 0.0  ;;  %v681_v19 = vmax.f32 %v665_v12, 0.0  ;;  %v499_v63 = vmul.f32 %v1388_v53, %v483_v51  ;;  %v491_v4 = vmul.f32 %v1388_v53, %v475_v56 }
  0xcd   :  { %v419_v21 = vpop.permute.xlu1 %418  ;;  %v387_v23 = vpop.permute.xlu0 %386 }
  0xce   :  { %v721_v22 = vmul.f32 %v689_v14, %v689_v14  ;;  %v713_v18 = vmul.f32 %v681_v19, %v681_v19  ;;  %v436_v60 = vsub.f32 %v1383_v42, %v419_v21  ;;  %v428_v0 = vsub.f32 %v1383_v42, %v387_v23 }
  0xd0   :  { %v737_v27 = vmul.f32 %v721_v22, %v1399_v11  ;;  %v729_v28 = vmul.f32 %v713_v18, %v1399_v11  ;;  %v452_v6 = vmax.f32 %v436_v60, 0.0  ;;  %v444_v14 = vmax.f32 %v428_v0, 0.0 }
  0xd1   :  { %v651_v32 = vpop.permute.xlu1 %650  ;;  %v619_v36 = vpop.permute.xlu0 %618 }
  0xd2   :  { %1008 = vadd.xlane.f32.xlu1 %v737_v27  ;;  %992 = vadd.xlane.f32.xlu0 %v729_v28  ;;  %v674_v44 = vsub.f32 %v651_v32, %v1383_v42  ;;  %v666_v47 = vsub.f32 %v619_v36, %v1383_v42  ;;  %v484_v21 = vmul.f32 %v452_v6, %v452_v6 }
  0xd3   :  { %v476_v23 = vmul.f32 %v444_v14, %v444_v14 }
  0xd4   :  { %v690_v52 = vmax.f32 %v674_v44, 0.0  ;;  %v682_v57 = vmax.f32 %v666_v47, 0.0  ;;  %v500_v27 = vmul.f32 %v1388_v53, %v484_v21 }
  0xd5   :  { %v655_v48 = vpop.permute.xlu1 %654  ;;  %v623_v50 = vpop.permute.xlu0 %622 }
  0xd6   :  { %846 = vadd.xlane.f32.xlu1 %v496_v37  ;;  %830 = vadd.xlane.f32.xlu0 %v488_v40  ;;  %v675_v54 = vsub.f32 %v655_v48, %v1383_v42  ;;  %v667_v58 = vsub.f32 %v623_v50, %v1383_v42  ;;  %v722_v61 = vmul.f32 %v690_v52, %v690_v52 }
  0xd7   :  { %v714_v1 = vmul.f32 %v682_v57, %v682_v57 }
  0xd8   :  { %v691_v62 = vmax.f32 %v675_v54, 0.0  ;;  %v683_v2 = vmax.f32 %v667_v58, 0.0  ;;  %v738_v15 = vmul.f32 %v722_v61, %v1399_v11 }
  0xd9   :  { %v659_v3 = vpop.permute.xlu1 %658  ;;  %v627_v5 = vpop.permute.xlu0 %626  ;;  %v730_v17 = vmul.f32 %v714_v1, %v1399_v11 }
  0xda   :  { %850 = vadd.xlane.f32.xlu1 %v498_v45  ;;  %834 = vadd.xlane.f32.xlu0 %v490_v49  ;;  %v723_v12 = vmul.f32 %v691_v62, %v691_v62  ;;  %v676_v13 = vsub.f32 %v659_v3, %v1383_v42  ;;  %v715_v19 = vmul.f32 %v683_v2, %v683_v2 }
  0xdb   :  { %v668_v20 = vsub.f32 %v627_v5, %v1383_v42  ;;  %v492_v42 = vmul.f32 %v1388_v53, %v476_v23 }
  0xdc   :  { %v692_v22 = vmax.f32 %v676_v13, 0.0  ;;  %v739_v18 = vmul.f32 %v723_v12, %v1399_v11  ;;  %v731_v25 = vmul.f32 %v715_v19, %v1399_v11 }
  0xdd   :  { %v684_v24 = vmax.f32 %v668_v20, 0.0 }
  0xde   :  { %1006 = vadd.xlane.f32.xlu1 %v736_v55  ;;  %990 = vadd.xlane.f32.xlu0 %v728_v59  ;;  %v724_v26 = vmul.f32 %v692_v22, %v692_v22 }
  0xdf   :  { %v716_v28 = vmul.f32 %v684_v24, %v684_v24 }
  0xe0   :  { %v740_v29 = vmul.f32 %v724_v26, %v1399_v11 }
  0xe1   :  { %v732_v30 = vmul.f32 %v716_v28, %v1399_v11 }
  0xe2   :  { %852 = vadd.xlane.f32.xlu1 %v499_v63  ;;  %836 = vadd.xlane.f32.xlu0 %v491_v4 }
  0xe6   :  { %1010 = vadd.xlane.f32.xlu1 %v738_v15  ;;  %994 = vadd.xlane.f32.xlu0 %v730_v17 }
  0xea   :  { %1012 = vadd.xlane.f32.xlu1 %v739_v18  ;;  %996 = vadd.xlane.f32.xlu0 %v731_v25 }
  0xee   :  { %854 = vadd.xlane.f32.xlu1 %v500_v27  ;;  %838 = vadd.xlane.f32.xlu0 %v492_v42 }
  0xf2   :  { %1014 = vadd.xlane.f32.xlu1 %v740_v29  ;;  %998 = vadd.xlane.f32.xlu0 %v732_v30 }
 0x10b   :  { %v784_v31 = vpop.xlane.xlu1 %783 }
 0x10c   :  { %v785_v32 = vrot.slane %v784_v31, 4 }
 0x10e   :  { %v786_v33 = vmax.f32 %v784_v31, %v785_v32 }
 0x110   :  { %v787_v34 = vrot.slane %v786_v33, 2 }
 0x112   :  { %v788_v35 = vmax.f32 %v786_v33, %v787_v34 }
 0x114   :  { %v789_v36 = vrot.slane %v788_v35, 1 }
 0x116   :  { %v790_v37 = vmax.f32 %v788_v35, %v789_v36 }
 0x118   :  { %1201 = vpush %v790_v37 }
 0x133   :  { %v825_v38 = vpop.xlane.xlu0 %824 }
 0x134   :  { %v877_v0 = vrot.slane %v825_v38, %v1296_v8 }
 0x137   :  { %v841_v10 = vpop.xlane.xlu0 %840 }
 0x138   :  { %v909_v61 = vrot.slane %v841_v10, %v1296_v8 }
 0x13b   :  { %v827_v39 = vpop.xlane.xlu1 %826  ;;  %v985_v40 = vpop.xlane.xlu0 %984 }
 0x13c   :  { %v881_v62 = vrot.slane %v827_v39, %v1296_v8  ;;  %v1035_v5 = vrot.slane %v985_v40, %v1296_v8 }
 0x13e   :  { %v939_v13 = vsel %vm938_vm2, %v881_v62, %v877_v0 }
 0x13f   :  { %v845_v53 = vpop.xlane.xlu1 %844 }
 0x140   :  { %v917_v6 = vrot.slane %v845_v53, %v1296_v8 }
 0x143   :  { %v987_v43 = vpop.xlane.xlu1 %986 }
 0x144   :  { %v1039_v15 = vrot.slane %v987_v43, %v1296_v8 }
 0x146   :  { %v1096_v31 = vsel %vm938_vm2, %v1039_v15, %v1035_v5 }
 0x147   :  { %v1001_v41 = vpop.xlane.xlu0 %1000  ;;  %v1003_v45 = vpop.xlane.xlu1 %1002 }
 0x148   :  { %v1071_v14 = vrot.slane %v1003_v45, %v1296_v8  ;;  %v1067_v19 = vrot.slane %v1001_v41, %v1296_v8 }
 0x149   :  { %s1202_s5 = spop %1201 }
 0x14a   :  { %v1103_v32 = vsel %vm938_vm2, %v1071_v14, %v1067_v19 }
 0x14b   :  { %v843_v44 = vpop.xlane.xlu0 %842  ;;  %v849_v46 = vpop.xlane.xlu1 %848 }
 0x14c   :  { %v913_v58 = vrot.slane %v843_v44, %v1296_v8  ;;  %v925_v27 = vrot.slane %v849_v46, %v1296_v8 }
 0x14e   :  { %v952_v1 = vsel %vm938_vm2, %v913_v58, %v909_v61 }
 0x14f   :  { %v829_v11 = vpop.xlane.xlu0 %828  ;;  %v1005_v47 = vpop.xlane.xlu1 %1004  ;;  %v953_v22 = vsel %vm940_vm3, %v917_v6, %v952_v1 }
 0x150   :  { %v885_v63 = vrot.slane %v829_v11, %v1296_v8  ;;  %v1075_v20 = vrot.slane %v1005_v47, %v1296_v8 }
 0x152   :  { %v941_v17 = vsel %vm940_vm3, %v885_v63, %v939_v13  ;;  %v1104_v34 = vsel %vm940_vm3, %v1075_v20, %v1103_v32 }
 0x153   :  { %v833_v16 = vpop.xlane.xlu0 %832 }
 0x154   :  { %v893_v28 = vrot.slane %v833_v16, %v1296_v8 }
 0x157   :  { %v989_v48 = vpop.xlane.xlu0 %988 }
 0x158   :  { %v1043_v21 = vrot.slane %v989_v48, %v1296_v8 }
 0x15a   :  { %v1097_v38 = vsel %vm940_vm3, %v1043_v21, %v1096_v31 }
 0x15f   :  { %v1463_v49 = vpop.xlane.xlu1 %1008  ;;  %v1465_v50 = vpop.xlane.xlu0 %992 }
 0x160   :  { %v1083_v39 = vrot.slane %v1463_v49, %v1296_v8  ;;  %v1051_v49 = vrot.slane %v1465_v50, %v1296_v8 }
 0x163   :  { %v847_v51 = vpop.xlane.xlu1 %846  ;;  %v831_v52 = vpop.xlane.xlu0 %830 }
 0x164   :  { %v921_v2 = vrot.slane %v847_v51, %v1296_v8  ;;  %v889_v3 = vrot.slane %v831_v52, %v1296_v8 }
 0x166   :  { %v954_v18 = vsel %vm942_vm4, %v921_v2, %v953_v22  ;;  %v943_v23 = vsel %vm942_vm4, %v889_v3, %v941_v17  ;;  %v804_v22 = vstv %s803_s10 }
 0x167   :  { %v851_v54 = vpop.xlane.xlu1 %850  ;;  %v835_v55 = vpop.xlane.xlu0 %834  ;;  %v955_v35 = vsel %vm944_vm5, %v925_v27, %v954_v18  ;;  %v945_v36 = vsel %vm944_vm5, %v893_v28, %v943_v23  ;;  %v777_v18 = vld [vmem:[%s1567_s1 + $0x8] sm:$0xff]  ;;  %vm805_vm10 = vcmp.eq.s32.totalorder %v804_v22, 1 }
 0x168   :  { %v929_v24 = vrot.slane %v851_v54, %v1296_v8  ;;  %v897_v25 = vrot.slane %v835_v55, %v1296_v8 }
 0x16a   :  { %v956_v10 = vsel %vm946_vm6, %v929_v24, %v955_v35  ;;  %v947_v53 = vsel %vm946_vm6, %v897_v25, %v945_v36  ;;  %v776_v24 = vld [vmem:[%s1567_s1] sm:$0xff] }
 0x16b   :  { %v1007_v56 = vpop.xlane.xlu1 %1006  ;;  %v991_v57 = vpop.xlane.xlu0 %990  ;;  %v778_v31 = vsub.f32 1.0, %v776_v24 }
 0x16c   :  { %v1079_v42 = vrot.slane %v1007_v56, %v1296_v8  ;;  %v1047_v29 = vrot.slane %v991_v57, %v1296_v8 }
 0x16e   :  { %v1105_v41 = vsel %vm942_vm4, %v1079_v42, %v1104_v34  ;;  %v1098_v43 = vsel %vm942_vm4, %v1047_v29, %v1097_v38  ;;  %v779_v42 = vsub.f32 1.0, %v777_v18 }
 0x16f   :  { %v853_v59 = vpop.xlane.xlu1 %852  ;;  %v1468_v60 = vpop.xlane.xlu0 %836  ;;  %v1106_v55 = vsel %vm944_vm5, %v1083_v39, %v1105_v41 }
 0x170   :  { %v933_v33 = vrot.slane %v853_v59, %v1296_v8  ;;  %v901_v37 = vrot.slane %v1468_v60, %v1296_v8  ;;  %v1099_v60 = vsel %vm944_vm5, %v1051_v49, %v1098_v43 }
 0x172   :  { %v957_v48 = vsel %vm948_vm7, %v933_v33, %v956_v10  ;;  %v949_v54 = vsel %vm948_vm7, %v901_v37, %v947_v53  ;;  %v1154_v53 = vsel %vm1122_vm11, %v776_v24, 0.0 }
 0x173   :  { %v1011_v4 = vpop.xlane.xlu1 %1010  ;;  %v995_v12 = vpop.xlane.xlu0 %994 }
 0x174   :  { %v1087_v44 = vrot.slane %v1011_v4, %v1296_v8  ;;  %v1055_v46 = vrot.slane %v995_v12, %v1296_v8  ;;  %v792_v12 = vstv %s1202_s5 }
 0x175   :  { %v794_v13 = vsub.f32 %v1294_v7, %v792_v12 }
 0x176   :  { %v1107_v59 = vsel %vm946_vm6, %v1087_v44, %v1106_v55  ;;  %v1100_v63 = vsel %vm946_vm6, %v1055_v46, %v1099_v60 }
 0x177   :  { %v1013_v26 = vpop.xlane.xlu1 %1012  ;;  %v997_v30 = vpop.xlane.xlu0 %996  ;;  %v796_v15 = vmax.f32 %v794_v13, 0.0 }
 0x178   :  { %v1091_v16 = vrot.slane %v1013_v26, %v1296_v8  ;;  %v1059_v51 = vrot.slane %v997_v30, %v1296_v8 }
 0x179   :  { %v798_v19 = vsub.f32 0.0, %v796_v15 }
 0x17a   :  { %v1108_v1 = vsel %vm948_vm7, %v1091_v16, %v1107_v59  ;;  %v1101_v3 = vsel %vm948_vm7, %v1059_v51, %v1100_v63 }
 0x17b   :  { %v855_v40 = vpop.xlane.xlu1 %854  ;;  %v839_v11 = vpop.xlane.xlu0 %838  ;;  %v801_v17 = vmul.f32 1.442695, %v798_v19 }
 0x17c   :  { %v937_v45 = vrot.slane %v855_v40, %v1296_v8  ;;  %v905_v47 = vrot.slane %v839_v11, %v1296_v8  ;;  %v1155_v40 = vsel %vm1122_vm11, %v777_v18, 0.0  ;;  %v1170_v11 = vsel %vm1122_vm11, %v1294_v7, 0.0 }
 0x17d   :  { %1218 = vpow2.f32 %v801_v17  ;;  %v1156_v16 = vadd.f32 %v1155_v40, %v1154_v53 }
 0x17e   :  { %v958_v52 = vsel %vm950_vm8, %v937_v45, %v957_v48  ;;  %v951_v58 = vsel %vm950_vm8, %v905_v47, %v949_v54  ;;  %v1169_v45 = vsel %vm1122_vm11, %v1301_v9, 0.0 }
 0x17f   :  { %v1015_v56 = vpop.xlane.xlu1 %1014  ;;  %v965_v57 = vsel %vm961_vm9, %v958_v52, 0.0  ;;  %v999_v50 = vpop.xlane.xlu0 %998  ;;  %v962_v62 = vsel %vm961_vm9, %v951_v58, 0.0  ;;  %v1171_v47 = vadd.f32 %v1170_v11, %v1169_v45 }
 0x180   :  { %v1095_v61 = vrot.slane %v1015_v56, %v1296_v8  ;;  %966 = vadd.xlane.f32.xlu1 %v965_v57  ;;  %v1063_v0 = vrot.slane %v999_v50, %v1296_v8  ;;  %963 = vadd.xlane.f32.xlu0 %v962_v62  ;;  %v793_v8 = vsub.f32 %v1301_v9, %v792_v12 }
 0x182   :  { %v1109_v2 = vsel %vm950_vm8, %v1095_v61, %v1108_v1  ;;  %v1102_v5 = vsel %vm950_vm8, %v1063_v0, %v1101_v3  ;;  %v795_v14 = vmax.f32 %v793_v8, 0.0 }
 0x183   :  { %v1115_v4 = vsel %vm961_vm9, %v1109_v2, 0.0  ;;  %v1112_v6 = vsel %vm961_vm9, %v1102_v5, 0.0 }
 0x184   :  { %1116 = vadd.xlane.f32.xlu1 %v1115_v4  ;;  %1113 = vadd.xlane.f32.xlu0 %v1112_v6  ;;  %v797_v20 = vsub.f32 0.0, %v795_v14 }
 0x186   :  { %v799_v21 = vmul.f32 1.442695, %v797_v20 }
 0x187   :  { %v1219_v23 = vpop.eup %1218 }
 0x188   :  { %1220 = vpow2.f32 %v799_v21  ;;  %v807_v29 = vsel %vm805_vm10, %v1219_v23, 1.0 }
 0x192   :  { %v1221_v25 = vpop.eup %1220 }
 0x193   :  { %v806_v33 = vsel %vm805_vm10, %v1221_v25, 1.0 }
 0x20d   :  { %v967_v26 = vpop.xlane.xlu1 %966  ;;  %v964_v28 = vpop.xlane.xlu0 %963 }
 0x20e   :  { %v1119_v27 = vmul.f32 %v967_v26, %v777_v18  ;;  %v1118_v30 = vmul.f32 %v964_v28, %v776_v24 }
 0x210   :  { %v1121_v32 = vmul.f32 %v1119_v27, %v807_v29  ;;  %v1120_v34 = vmul.f32 %v1118_v30, %v806_v33 }
 0x211   :  { %v1117_v35 = vpop.xlane.xlu1 %1116  ;;  %v1114_v37 = vpop.xlane.xlu0 %1113 }
 0x212   :  { %v1137_v36 = vmul.f32 %v1117_v35, %v779_v42  ;;  %v1124_v38 = vsel %vm1122_vm11, %v1121_v32, 0.0  ;;  %v1136_v39 = vmul.f32 %v1114_v37, %v778_v31  ;;  %v1123_v10 = vsel %vm1122_vm11, %v1120_v34, 0.0 }
 0x213   :  { %v1125_v41 = vadd.f32 %v1124_v38, %v1123_v10 }
 0x214   :  { %v1139_v43 = vsel %vm1122_vm11, %v1137_v36, 0.0  ;;  %v1138_v44 = vsel %vm1122_vm11, %v1136_v39, 0.0 }
 0x215   :  { %1126 = vadd.xlane.f32.xlu0 %v1125_v41  ;;  %v1140_v46 = vadd.f32 %v1139_v43, %v1138_v44 }
 0x217   :  { %1141 = vadd.xlane.f32.xlu1 %v1140_v46 }
 0x219   :  { %1157 = vadd.xlane.f32.xlu0 %v1156_v16 }
 0x21b   :  { %1172 = vadd.xlane.f32.xlu1 %v1171_v47 }
 0x2a2   :  { %v1127_v48 = vpop.xlane.xlu0 %1126 }
 0x2a3   :  { %v1128_v49 = vrot.slane %v1127_v48, 4 }
 0x2a4   :  { %v1142_v51 = vpop.xlane.xlu1 %1141 }
 0x2a5   :  { %v1129_v52 = vadd.f32 %v1128_v49, %v1127_v48  ;;  %v1143_v54 = vrot.slane %v1142_v51, 4 }
 0x2a6   :  { %v1158_v55 = vpop.xlane.xlu0 %1157 }
 0x2a7   :  { %v1130_v56 = vrot.slane %v1129_v52, 2  ;;  %v1144_v57 = vadd.f32 %v1143_v54, %v1142_v51  ;;  %v1159_v58 = vrot.slane %v1158_v55, 4 }
 0x2a8   :  { %v1173_v9 = vpop.xlane.xlu1 %1172 }
 0x2a9   :  { %v1145_v59 = vrot.slane %v1144_v57, 2  ;;  %v1160_v60 = vadd.f32 %v1159_v58, %v1158_v55  ;;  %v1174_v7 = vrot.slane %v1173_v9, 4  ;;  %v1131_v61 = vadd.f32 %v1130_v56, %v1129_v52 }
 0x2ab   :  { %v1161_v50 = vrot.slane %v1160_v60, 2  ;;  %v1175_v62 = vadd.f32 %v1174_v7, %v1173_v9  ;;  %v1132_v63 = vrot.slane %v1131_v61, 1  ;;  %v1146_v0 = vadd.f32 %v1145_v59, %v1144_v57 }
 0x2ad   :  { %v1162_v1 = vadd.f32 %v1161_v50, %v1160_v60  ;;  %v1176_v2 = vrot.slane %v1175_v62, 2  ;;  %v1133_v3 = vadd.f32 %v1132_v63, %v1131_v61  ;;  %v1147_v4 = vrot.slane %v1146_v0, 1 }
 0x2af   :  { %v1177_v5 = vadd.f32 %v1176_v2, %v1175_v62  ;;  %1203 = vpush %v1133_v3  ;;  %v1148_v6 = vadd.f32 %v1147_v4, %v1146_v0  ;;  %v1163_v12 = vrot.slane %v1162_v1, 1 }
 0x2b1   :  { %1205 = vpush %v1148_v6  ;;  %v1164_v13 = vadd.f32 %v1163_v12, %v1162_v1  ;;  %v1178_v8 = vrot.slane %v1177_v5, 1 }
 0x2b3   :  { %1207 = vpush %v1164_v13  ;;  %v1179_v15 = vadd.f32 %v1178_v8, %v1177_v5 }
 0x2b5   :  { %1209 = vpush %v1179_v15 }
 0x2e0   :  { %s1204_s1 = spop %1203 }
 0x2e1   :  { %s1135_s15 = smul.f32 0.0001, %s1204_s1 }
 0x2e2   :  { %s1206_s16 = spop %1205 }
 0x2e3   :  { %s1150_s17 = smul.f32 0.0001, %s1206_s16 }
 0x2e4   :  { %s1208_s18 = spop %1207 }
 0x2e5   :  { %s1151_s19 = sadd.f32 %s1150_s17, %s1135_s15  ;;  %p1166_p6 = scmp.lt.f32.partialorder %s1208_s18, 0.5 }
 0x2e6   :  { %p1167_p7 = scmp.gt.f32.partialorder %s1208_s18, 15.5  ;;  %s1210_s20 = spop %1209 }
 0x2e7   :  { %p1152_p8 = scmp.ne.f32.partialorder %s1151_s19, %s1151_s19  ;;  %s1181_s21 = smul.f32 1e-09, %s1210_s20 }
 0x2e8   :  { %p1168_p9 = por %p1167_p7, %p1166_p6 }
 0x2e9   :  { %s1574_s19 = smov (%p1152_p8, %s1151_s19), 0.0 }
 0x2ea   :  { %s1576_s21 = smov (!%p1168_p9, %s1181_s21), %s1574_s19 }
 0x2eb   :  { %1184 = sst [smem:[#allocation8]] %s1576_s21 }
 0x2ec   :  { %1243 = shalt.err (!%p1240_p12)
}
 0x2ed   :  { %s1252_s28 = smov [#allocation8]  }
 0x2ee   :  { %1192 = dma.smem_to_hbm %s1252_s28, 16, %s1572_s6, [#allocation6]  }
 0x2ef   :  { %1246 = dma.done.wait [#allocation6], 16  }
 0x2f0   :  { %1247 = vsyncadd [#allocation6], 4294967280 }
 0x2f1   :  { %1196 = sfence }
 0x2f2   :  { %1197 = vsyncpa [#allocation6], 1 }
 0x2f3   :  { %1198 = vsyncpa [#allocation7], 1 }

</bundles_post_ra>
